<compile_context>
chip_gen: v5e
topology: v5e:2x2
jax: 0.10.0
libtpu: 0.0.40
codegen_flags: <defaults>
</compile_context>

<pallas_src>
import functools
import numpy as np
import jax
import jax.numpy as jnp
from jax import lax
from jax.experimental import pallas as pl
from jax.experimental.pallas import tpu as pltpu

SQRT_HALF = 0.7071067811865476


def _erf_poly(x):
    # Abramowitz & Stegun 7.1.26: max abs error ~1.5e-7, uses only exp/mul/add/select.
    a1, a2, a3, a4, a5 = (0.254829592, -0.284496736, 1.421413741,
                          -1.453152027, 1.061405429)
    p = 0.3275911
    ax = jnp.abs(x)
    t = 1.0 / (1.0 + p * ax)
    poly = ((((a5 * t + a4) * t + a3) * t + a2) * t + a1) * t
    r = 1.0 - poly * jnp.exp(-ax * ax)
    return jnp.where(x < 0.0, -r, r)


def _gelu_kernel(x):
    # matches torch.nn.GELU() (exact erf-based) to ~1e-7
    return 0.5 * x * (1.0 + _erf_poly(x * SQRT_HALF))


def _gelu_ref(x):
    return 0.5 * x * (1.0 + lax.erf(x * SQRT_HALF))


def mapc_kernel(x_ref, g_ref, w1_ref, b1_ref, w0h_ref, b0h_ref, wsh_ref, bsh_ref,
                wc1_ref, bc1_ref, w2_ref, b2_ref, o_ref, *, ng):
    C, TN = x_ref.shape

    x_bf = x_ref[...]                                # bf16 (C, TN)
    g = g_ref[...]                                   # int32 (1, TN): group index / lane

    def mm(w_ref, v_bf):
        # 1x1 conv over channels on the MXU: bf16 operands, f32 accumulation.
        return jnp.dot(w_ref[...], v_bf, preferred_element_type=jnp.float32)

    # proj_1 + exact GELU (erf), f32 element-wise math
    y = mm(w1_ref, x_bf) + b1_ref[...]
    y = _gelu_kernel(y)
    u = y                                            # u = x.clone() inside LSKA_h

    def dw_conv(v, w_ref, b_ref, dil):
        # depthwise (1,5) conv along the group axis == +-dil, +-2*dil lane shifts
        # inside each ng-wide row.  Shifts run on the XLU; the conv's zero padding
        # at the row edges is one compare on the tiny (1, TN) group-index vector
        # plus one select on the full tile per tap.
        w = w_ref[...]                               # (C, 5) f32 taps
        acc = w[:, 2:3] * v                          # center tap (offset 0)
        for k in (0, 1, 3, 4):
            off = (k - 2) * dil                      # static python int
            if abs(off) >= ng:                       # tap always in the zero padding
                continue
            shifted = pltpu.roll(v, shift=(-off) % TN, axis=1)   # out[:,i] = v[:,i+off]
            valid = (g < ng - off) if off > 0 else (g >= -off)
            acc = acc + w[:, k:k + 1] * jnp.where(valid, shifted, 0.0)
        return acc + b_ref[...]

    a = dw_conv(y, w0h_ref, b0h_ref, 1)              # conv0h        (dil=1, pad=2)
    a = dw_conv(a, wsh_ref, bsh_ref, 3)              # conv_spatial  (dil=3, pad=6)
    a = mm(wc1_ref, a.astype(jnp.bfloat16)) + bc1_ref[...]   # conv1 (1x1)
    y = u * a                                        # gate

    y = mm(w2_ref, y.astype(jnp.bfloat16)) + b2_ref[...]     # proj_2

    # fused residual (unsort is a pure permutation, so it commutes with the add)
    o_ref[...] = (x_bf.astype(jnp.float32) + y).astype(o_ref.dtype)


def _pick_tile_cols(n, gs, ng, target_lanes=4096):
    """Largest lane-dense column tile made of whole ng-wide rows (no halo needed)."""
    if n <= target_lanes:
        return n
    best = 0
    for k in range(1, gs + 1):
        if gs % k:
            continue
        tn = k * ng
        if tn > target_lanes:
            break
        if tn % 128 == 0:
            best = tn
    if best == 0:
        # TODO(synk): for ng > target_lanes tile inside a row with a +-8 column halo
        # instead of falling back to the whole image.
        best = n
    return best


def mapc_pallas(x, sa, params, category_size=64):
    b, c, h, w = x.shape
    n = h * w
    gs = min(n, category_size)
    # the reference PyTorch code's final reshape requires ng*gs == n
    assert n % gs == 0, "MAPC reference only supports n % gs == 0"
    ng = n // gs

    xc = x.reshape(b, c, n)
    sim = sa.reshape(b, n)

    # sort / index_reverse / feature_shuffle (plain-JAX glue).  The gather writes
    # directly in the "s-major" layout (column t' = s*ng + g) so the kernel's
    # depthwise convs become small lane shifts and N-tiling needs no halo.
    # TODO(synk): fuse this gather and the post-kernel unsort into the kernel via
    # PrefetchScalarGridSpec-prefetched indices to remove the extra b*n*c HBM round
    # trip on each side.
    idx = jnp.argsort(sim, axis=-1)                                   # (b, n)
    idx2 = idx.reshape(b, ng, gs).transpose(0, 2, 1).reshape(b, n)    # s-major order
    idx2_rev = jnp.argsort(idx2, axis=-1)                             # inverse perm
    shuffled = jnp.take_along_axis(xc, idx2[:, None, :], axis=2)      # (b, c, n)
    shuffled = shuffled.astype(jnp.bfloat16)                          # bf16 HBM I/O

    # group index of every column (g = t' % ng), same for every batch / tile;
    # passed as data so the kernel needs no iota / integer mod.
    gidx = jnp.tile(jnp.arange(ng, dtype=jnp.int32), gs).reshape(1, n)

    # weights: 1x1 convs as bf16 (C,C) MXU operands; dw taps (C,5) and biases (C,1) f32
    w1 = params["proj1_w"][:, :, 0, 0].astype(jnp.bfloat16)
    b1 = params["proj1_b"][:, None].astype(jnp.float32)
    w0h = params["conv0h_w"][:, 0, 0, :].astype(jnp.float32)
    b0h = params["conv0h_b"][:, None].astype(jnp.float32)
    wsh = params["convsp_w"][:, 0, 0, :].astype(jnp.float32)
    bsh = params["convsp_b"][:, None].astype(jnp.float32)
    wc1 = params["conv1_w"][:, :, 0, 0].astype(jnp.bfloat16)
    bc1 = params["conv1_b"][:, None].astype(jnp.float32)
    w2 = params["proj2_w"][:, :, 0, 0].astype(jnp.bfloat16)
    b2 = params["proj2_b"][:, None].astype(jnp.float32)

    tn = _pick_tile_cols(n, gs, ng)
    num_tiles = n // tn

    kernel = functools.partial(mapc_kernel, ng=ng)

    data_in = pl.BlockSpec((None, c, tn), lambda i, j: (i, 0, j))
    data_out = pl.BlockSpec((None, c, tn), lambda i, j: (i, 0, j))
    g_spec = pl.BlockSpec((1, tn), lambda i, j: (0, j))
    # TODO(synk): give these constant weight specs pipeline_mode=pl.Buffered(1) once
    # that flag is guaranteed to be honoured by the pallas_call TPU pipeline.
    full = lambda arr: pl.BlockSpec(arr.shape, lambda i, j: (0, 0))

    # VMEM budget derived from the actual tile sizes (cap at 48 MiB: keeps headroom
    # under v7x's 64 MiB per-TC VMEM, trivially fine on v5e/v6e's 128 MiB).
    in_blk = c * tn * 2
    out_blk = c * tn * 4
    w_bytes = 3 * c * c * 2 + 2 * c * 5 * 4 + 5 * c * 4 + n * 4
    tmp_bytes = 10 * c * tn * 4
    vmem_limit = int(min(48 << 20,
                         max(32 << 20, 2 * (in_blk + out_blk) + 2 * w_bytes + tmp_bytes)))

    cost = pl.CostEstimate(
        flops=int(b * (3 * 2 * c * c * n + 2 * 2 * 5 * c * n + 6 * c * n)),
        transcendentals=int(b * c * n),
        bytes_accessed=int(b * c * n * (2 + 4) + b * n * 4 + w_bytes),
    )

    y = pl.pallas_call(
        kernel,
        out_shape=jax.ShapeDtypeStruct((b, c, n), jnp.float32),
        grid=(b, num_tiles),
        in_specs=[data_in, g_spec,
                  full(w1), full(b1),
                  full(w0h), full(b0h),
                  full(wsh), full(bsh),
                  full(wc1), full(bc1),
                  full(w2), full(b2)],
        out_specs=data_out,
        compiler_params=pltpu.CompilerParams(
            dimension_semantics=("parallel", "parallel"),
            vmem_limit_bytes=vmem_limit),
        cost_estimate=cost,
    )(shuffled, gidx, w1, b1, w0h, b0h, wsh, bsh, wc1, bc1, w2, b2)

    # unsort (pure permutation; residual already added in-kernel), back to NCHW
    y = jnp.take_along_axis(y, idx2_rev[:, None, :], axis=2)
    return y.reshape(b, c, h, w)


# ---------------- pure-JAX reference (for verification only) ----------------
def mapc_ref(x, sa, params, category_size=64):
    b, c, h, w = x.shape
    n = h * w
    gs = min(n, category_size)
    ng = n // gs
    xf = jnp.transpose(x, (0, 2, 3, 1)).reshape(b, n, c)
    sim = jnp.transpose(sa, (0, 2, 3, 1)).reshape(b, n)
    idx = jnp.argsort(sim, axis=-1)
    idx_rev = jnp.argsort(idx, axis=-1)
    sh = jnp.take_along_axis(xf, idx[..., None], axis=1)
    y = sh.reshape(b, ng, gs, c).transpose(0, 3, 2, 1)  # (b, c, gs, ng)

    def conv1x1(v, w4, bias):
        return jnp.einsum('bchw,oc->bohw', v, w4[:, :, 0, 0]) + bias[None, :, None, None]

    def dwconv(v, w4, bias, pad, dil):
        out = lax.conv_general_dilated(
            v, w4, window_strides=(1, 1),
            padding=((0, 0), (pad, pad)),
            rhs_dilation=(1, dil),
            dimension_numbers=('NCHW', 'OIHW', 'NCHW'),
            feature_group_count=c)
        return out + bias[None, :, None, None]

    y = conv1x1(y, params["proj1_w"], params["proj1_b"])
    y = _gelu_ref(y)
    u = y
    a = dwconv(y, params["conv0h_w"], params["conv0h_b"], 2, 1)
    a = dwconv(a, params["convsp_w"], params["convsp_b"], 6, 3)
    a = conv1x1(a, params["conv1_w"], params["conv1_b"])
    y = u * a
    y = conv1x1(y, params["proj2_w"], params["proj2_b"])
    y = y.transpose(0, 3, 2, 1).reshape(b, n, c)
    y = jnp.take_along_axis(y, idx_rev[..., None], axis=1)
    y = xf + y
    return y.reshape(b, h, w, c).transpose(0, 3, 1, 2)


if __name__ == "__main__":
    key = jax.random.PRNGKey(0)
    b, c, h, w = 2, 8, 16, 16          # dim = 8; n = 256; gs = 64; ng = 4
    ks = jax.random.split(key, 12)
    x = jax.random.normal(ks[0], (b, c, h, w), jnp.float32)
    sa = jax.random.normal(ks[1], (b, 1, h, w), jnp.float32)

    params = {
        "proj1_w":  0.10 * jax.random.normal(ks[2], (c, c, 1, 1), jnp.float32),
        "proj1_b":  0.05 * jax.random.normal(ks[3], (c,), jnp.float32),
        "conv0h_w": 0.10 * jax.random.normal(ks[4], (c, 1, 1, 5), jnp.float32),
        "conv0h_b": 0.05 * jax.random.normal(ks[5], (c,), jnp.float32),
        "convsp_w": 0.10 * jax.random.normal(ks[6], (c, 1, 1, 5), jnp.float32),
        "convsp_b": 0.05 * jax.random.normal(ks[7], (c,), jnp.float32),
        "conv1_w":  0.10 * jax.random.normal(ks[8], (c, c, 1, 1), jnp.float32),
        "conv1_b":  0.05 * jax.random.normal(ks[9], (c,), jnp.float32),
        "proj2_w":  0.10 * jax.random.normal(ks[10], (c, c, 1, 1), jnp.float32),
        "proj2_b":  0.05 * jax.random.normal(ks[11], (c,), jnp.float32),
    }

    out = jax.block_until_ready(mapc_pallas(x, sa, params, category_size=64))
    ref = jax.block_until_ready(mapc_ref(x, sa, params, category_size=64))

    assert out.shape == (b, c, h, w)
    err = float(jnp.max(jnp.abs(out - ref)))
    # tolerance covers bf16 HBM residency / MXU operands (f32 accumulation) vs the
    # pure-f32 reference
    if not np.isfinite(err) or err > 2e-2:
        raise RuntimeError(f"mismatch vs reference: max abs err = {err}")
    print("KERNEL_OK")
</pallas_src>

<mosaic_0001>
module attributes {stable_mosaic.version = 11 : i64} {
  func.func @mapc_kernel(%arg0: i32, %arg1: i32, %arg2: memref<1x8x256xbf16, #tpu.memory_space<vmem>>, %arg3: memref<1x256xi32, #tpu.memory_space<vmem>>, %arg4: memref<8x8xbf16, #tpu.memory_space<vmem>>, %arg5: memref<8x1xf32, #tpu.memory_space<vmem>>, %arg6: memref<8x5xf32, #tpu.memory_space<vmem>>, %arg7: memref<8x1xf32, #tpu.memory_space<vmem>>, %arg8: memref<8x5xf32, #tpu.memory_space<vmem>>, %arg9: memref<8x1xf32, #tpu.memory_space<vmem>>, %arg10: memref<8x8xbf16, #tpu.memory_space<vmem>>, %arg11: memref<8x1xf32, #tpu.memory_space<vmem>>, %arg12: memref<8x8xbf16, #tpu.memory_space<vmem>>, %arg13: memref<8x1xf32, #tpu.memory_space<vmem>>, %arg14: memref<1x8x256xf32, #tpu.memory_space<vmem>>) attributes {dimension_semantics = [#tpu.dimension_semantics<parallel>, #tpu.dimension_semantics<parallel>], iteration_bounds = array<i64: 2, 1>, scalar_prefetch = 0 : i64, scratch_operands = 0 : i64, tpu.core_type = #tpu.core_type<tc>, window_params = [{transform_indices = @transform_0, window_bounds = array<i64: 1, 8, 256>}, {transform_indices = @transform_1, window_bounds = array<i64: 1, 256>}, {pipeline_mode = #tpu.pipeline_mode<synchronous>, transform_indices = @transform_2, window_bounds = array<i64: 8, 8>}, {pipeline_mode = #tpu.pipeline_mode<synchronous>, transform_indices = @transform_3, window_bounds = array<i64: 8, 1>}, {pipeline_mode = #tpu.pipeline_mode<synchronous>, transform_indices = @transform_4, window_bounds = array<i64: 8, 5>}, {pipeline_mode = #tpu.pipeline_mode<synchronous>, transform_indices = @transform_5, window_bounds = array<i64: 8, 1>}, {pipeline_mode = #tpu.pipeline_mode<synchronous>, transform_indices = @transform_6, window_bounds = array<i64: 8, 5>}, {pipeline_mode = #tpu.pipeline_mode<synchronous>, transform_indices = @transform_7, window_bounds = array<i64: 8, 1>}, {pipeline_mode = #tpu.pipeline_mode<synchronous>, transform_indices = @transform_8, window_bounds = array<i64: 8, 8>}, {pipeline_mode = #tpu.pipeline_mode<synchronous>, transform_indices = @transform_9, window_bounds = array<i64: 8, 1>}, {pipeline_mode = #tpu.pipeline_mode<synchronous>, transform_indices = @transform_10, window_bounds = array<i64: 8, 8>}, {pipeline_mode = #tpu.pipeline_mode<synchronous>, transform_indices = @transform_11, window_bounds = array<i64: 8, 1>}, {transform_indices = @transform_12, window_bounds = array<i64: 1, 8, 256>}]} {
    %c0 = arith.constant 0 : index
    %c0_0 = arith.constant 0 : index
    %c0_1 = arith.constant 0 : index
    %0 = vector.load %arg2[%c0, %c0_0, %c0_1] : memref<1x8x256xbf16, #tpu.memory_space<vmem>>, vector<1x8x256xbf16>
    %1 = vector.shape_cast %0 : vector<1x8x256xbf16> to vector<8x256xbf16>
    %c0_2 = arith.constant 0 : index
    %c0_3 = arith.constant 0 : index
    %2 = vector.load %arg3[%c0_2, %c0_3] : memref<1x256xi32, #tpu.memory_space<vmem>>, vector<1x256xi32>
    %c0_4 = arith.constant 0 : index
    %c0_5 = arith.constant 0 : index
    %3 = vector.load %arg4[%c0_4, %c0_5] : memref<8x8xbf16, #tpu.memory_space<vmem>>, vector<8x8xbf16>
    %cst = arith.constant dense<0.000000e+00> : vector<8x256xf32>
    %4 = tpu.matmul %3, %1, %cst {dimension_numbers = #tpu.dot_dimension_numbers<[1], [0], [0], [1], [0, 0, 1, 1], [], []>} : vector<8x8xbf16>, vector<8x256xbf16>, vector<8x256xf32> -> vector<8x256xf32>
    %c0_6 = arith.constant 0 : index
    %c0_7 = arith.constant 0 : index
    %5 = vector.load %arg5[%c0_6, %c0_7] : memref<8x1xf32, #tpu.memory_space<vmem>>, vector<8x1xf32>
    %6 = vector.broadcast %5 : vector<8x1xf32> to vector<8x256xf32>
    %7 = arith.addf %4, %6 : vector<8x256xf32>
    %cst_8 = arith.constant 5.000000e-01 : f32
    %8 = vector.broadcast %cst_8 : f32 to vector<8x256xf32>
    %9 = arith.mulf %8, %7 : vector<8x256xf32>
    %cst_9 = arith.constant 0.707106769 : f32
    %10 = vector.broadcast %cst_9 : f32 to vector<8x256xf32>
    %11 = arith.mulf %7, %10 : vector<8x256xf32>
    %12 = math.absf %11 : vector<8x256xf32>
    %cst_10 = arith.constant 0.327591091 : f32
    %13 = vector.broadcast %cst_10 : f32 to vector<8x256xf32>
    %14 = arith.mulf %13, %12 : vector<8x256xf32>
    %cst_11 = arith.constant 1.000000e+00 : f32
    %15 = vector.broadcast %cst_11 : f32 to vector<8x256xf32>
    %16 = arith.addf %15, %14 : vector<8x256xf32>
    %cst_12 = arith.constant 1.000000e+00 : f32
    %17 = vector.broadcast %cst_12 : f32 to vector<8x256xf32>
    %18 = arith.divf %17, %16 : vector<8x256xf32>
    %cst_13 = arith.constant 1.06140542 : f32
    %19 = vector.broadcast %cst_13 : f32 to vector<8x256xf32>
    %20 = arith.mulf %19, %18 : vector<8x256xf32>
    %cst_14 = arith.constant -1.45315206 : f32
    %21 = vector.broadcast %cst_14 : f32 to vector<8x256xf32>
    %22 = arith.addf %20, %21 : vector<8x256xf32>
    %23 = arith.mulf %22, %18 : vector<8x256xf32>
    %cst_15 = arith.constant 1.42141378 : f32
    %24 = vector.broadcast %cst_15 : f32 to vector<8x256xf32>
    %25 = arith.addf %23, %24 : vector<8x256xf32>
    %26 = arith.mulf %25, %18 : vector<8x256xf32>
    %cst_16 = arith.constant -0.284496725 : f32
    %27 = vector.broadcast %cst_16 : f32 to vector<8x256xf32>
    %28 = arith.addf %26, %27 : vector<8x256xf32>
    %29 = arith.mulf %28, %18 : vector<8x256xf32>
    %cst_17 = arith.constant 0.254829586 : f32
    %30 = vector.broadcast %cst_17 : f32 to vector<8x256xf32>
    %31 = arith.addf %29, %30 : vector<8x256xf32>
    %32 = arith.mulf %31, %18 : vector<8x256xf32>
    %cst_18 = arith.constant 0.000000e+00 : f32
    %33 = vector.broadcast %cst_18 : f32 to vector<8x256xf32>
    %34 = arith.subf %33, %12 : vector<8x256xf32>
    %35 = arith.mulf %34, %12 : vector<8x256xf32>
    %36 = math.exp %35 : vector<8x256xf32>
    %37 = arith.mulf %32, %36 : vector<8x256xf32>
    %cst_19 = arith.constant 1.000000e+00 : f32
    %38 = vector.broadcast %cst_19 : f32 to vector<8x256xf32>
    %39 = arith.subf %38, %37 : vector<8x256xf32>
    %cst_20 = arith.constant 0.000000e+00 : f32
    %40 = vector.broadcast %cst_20 : f32 to vector<8x256xf32>
    %41 = arith.cmpf olt, %11, %40 : vector<8x256xf32>
    %cst_21 = arith.constant 0.000000e+00 : f32
    %42 = vector.broadcast %cst_21 : f32 to vector<8x256xf32>
    %43 = arith.subf %42, %39 : vector<8x256xf32>
    %44 = arith.select %41, %43, %39 : vector<8x256xi1>, vector<8x256xf32>
    %cst_22 = arith.constant 1.000000e+00 : f32
    %45 = vector.broadcast %cst_22 : f32 to vector<8x256xf32>
    %46 = arith.addf %45, %44 : vector<8x256xf32>
    %47 = arith.mulf %9, %46 : vector<8x256xf32>
    %c0_23 = arith.constant 0 : index
    %c0_24 = arith.constant 0 : index
    %48 = vector.load %arg6[%c0_23, %c0_24] : memref<8x5xf32, #tpu.memory_space<vmem>>, vector<8x5xf32>
    %49 = vector.extract_strided_slice %48 {offsets = [0, 2], sizes = [8, 1], strides = [1, 1]} : vector<8x5xf32> to vector<8x1xf32>
    %50 = vector.broadcast %49 : vector<8x1xf32> to vector<8x256xf32>
    %51 = arith.mulf %50, %47 : vector<8x256xf32>
    %c2_i32 = arith.constant 2 : i32
    %52 = tpu.dynamic_rotate %47 by %c2_i32 dim 1 : vector<8x256xf32>, i32 -> vector<8x256xf32>
    %c2_i32_25 = arith.constant 2 : i32
    %53 = vector.broadcast %c2_i32_25 : i32 to vector<1x256xi32>
    %54 = arith.cmpi sge, %2, %53 : vector<1x256xi32>
    %55 = vector.extract_strided_slice %48 {offsets = [0, 0], sizes = [8, 1], strides = [1, 1]} : vector<8x5xf32> to vector<8x1xf32>
    %cst_26 = arith.constant 0.000000e+00 : f32
    %56 = vector.shape_cast %54 : vector<1x256xi1> to vector<1x256xi1>
    %57 = vector.broadcast %56 : vector<1x256xi1> to vector<8x256xi1>
    %58 = vector.broadcast %cst_26 : f32 to vector<8x256xf32>
    %59 = arith.select %57, %52, %58 : vector<8x256xi1>, vector<8x256xf32>
    %60 = vector.broadcast %55 : vector<8x1xf32> to vector<8x256xf32>
    %61 = arith.mulf %60, %59 : vector<8x256xf32>
    %62 = arith.addf %51, %61 : vector<8x256xf32>
    %c1_i32 = arith.constant 1 : i32
    %63 = tpu.dynamic_rotate %47 by %c1_i32 dim 1 : vector<8x256xf32>, i32 -> vector<8x256xf32>
    %c1_i32_27 = arith.constant 1 : i32
    %64 = vector.broadcast %c1_i32_27 : i32 to vector<1x256xi32>
    %65 = arith.cmpi sge, %2, %64 : vector<1x256xi32>
    %66 = vector.extract_strided_slice %48 {offsets = [0, 1], sizes = [8, 1], strides = [1, 1]} : vector<8x5xf32> to vector<8x1xf32>
    %cst_28 = arith.constant 0.000000e+00 : f32
    %67 = vector.shape_cast %65 : vector<1x256xi1> to vector<1x256xi1>
    %68 = vector.broadcast %67 : vector<1x256xi1> to vector<8x256xi1>
    %69 = vector.broadcast %cst_28 : f32 to vector<8x256xf32>
    %70 = arith.select %68, %63, %69 : vector<8x256xi1>, vector<8x256xf32>
    %71 = vector.broadcast %66 : vector<8x1xf32> to vector<8x256xf32>
    %72 = arith.mulf %71, %70 : vector<8x256xf32>
    %73 = arith.addf %62, %72 : vector<8x256xf32>
    %c255_i32 = arith.constant 255 : i32
    %74 = tpu.dynamic_rotate %47 by %c255_i32 dim 1 : vector<8x256xf32>, i32 -> vector<8x256xf32>
    %c3_i32 = arith.constant 3 : i32
    %75 = vector.broadcast %c3_i32 : i32 to vector<1x256xi32>
    %76 = arith.cmpi slt, %2, %75 : vector<1x256xi32>
    %77 = vector.extract_strided_slice %48 {offsets = [0, 3], sizes = [8, 1], strides = [1, 1]} : vector<8x5xf32> to vector<8x1xf32>
    %cst_29 = arith.constant 0.000000e+00 : f32
    %78 = vector.shape_cast %76 : vector<1x256xi1> to vector<1x256xi1>
    %79 = vector.broadcast %78 : vector<1x256xi1> to vector<8x256xi1>
    %80 = vector.broadcast %cst_29 : f32 to vector<8x256xf32>
    %81 = arith.select %79, %74, %80 : vector<8x256xi1>, vector<8x256xf32>
    %82 = vector.broadcast %77 : vector<8x1xf32> to vector<8x256xf32>
    %83 = arith.mulf %82, %81 : vector<8x256xf32>
    %84 = arith.addf %73, %83 : vector<8x256xf32>
    %c254_i32 = arith.constant 254 : i32
    %85 = tpu.dynamic_rotate %47 by %c254_i32 dim 1 : vector<8x256xf32>, i32 -> vector<8x256xf32>
    %c2_i32_30 = arith.constant 2 : i32
    %86 = vector.broadcast %c2_i32_30 : i32 to vector<1x256xi32>
    %87 = arith.cmpi slt, %2, %86 : vector<1x256xi32>
    %88 = vector.extract_strided_slice %48 {offsets = [0, 4], sizes = [8, 1], strides = [1, 1]} : vector<8x5xf32> to vector<8x1xf32>
    %cst_31 = arith.constant 0.000000e+00 : f32
    %89 = vector.shape_cast %87 : vector<1x256xi1> to vector<1x256xi1>
    %90 = vector.broadcast %89 : vector<1x256xi1> to vector<8x256xi1>
    %91 = vector.broadcast %cst_31 : f32 to vector<8x256xf32>
    %92 = arith.select %90, %85, %91 : vector<8x256xi1>, vector<8x256xf32>
    %93 = vector.broadcast %88 : vector<8x1xf32> to vector<8x256xf32>
    %94 = arith.mulf %93, %92 : vector<8x256xf32>
    %95 = arith.addf %84, %94 : vector<8x256xf32>
    %c0_32 = arith.constant 0 : index
    %c0_33 = arith.constant 0 : index
    %96 = vector.load %arg7[%c0_32, %c0_33] : memref<8x1xf32, #tpu.memory_space<vmem>>, vector<8x1xf32>
    %97 = vector.broadcast %96 : vector<8x1xf32> to vector<8x256xf32>
    %98 = arith.addf %95, %97 : vector<8x256xf32>
    %c0_34 = arith.constant 0 : index
    %c0_35 = arith.constant 0 : index
    %99 = vector.load %arg8[%c0_34, %c0_35] : memref<8x5xf32, #tpu.memory_space<vmem>>, vector<8x5xf32>
    %100 = vector.extract_strided_slice %99 {offsets = [0, 2], sizes = [8, 1], strides = [1, 1]} : vector<8x5xf32> to vector<8x1xf32>
    %101 = vector.broadcast %100 : vector<8x1xf32> to vector<8x256xf32>
    %102 = arith.mulf %101, %98 : vector<8x256xf32>
    %c3_i32_36 = arith.constant 3 : i32
    %103 = tpu.dynamic_rotate %98 by %c3_i32_36 dim 1 : vector<8x256xf32>, i32 -> vector<8x256xf32>
    %c3_i32_37 = arith.constant 3 : i32
    %104 = vector.broadcast %c3_i32_37 : i32 to vector<1x256xi32>
    %105 = arith.cmpi sge, %2, %104 : vector<1x256xi32>
    %106 = vector.extract_strided_slice %99 {offsets = [0, 1], sizes = [8, 1], strides = [1, 1]} : vector<8x5xf32> to vector<8x1xf32>
    %cst_38 = arith.constant 0.000000e+00 : f32
    %107 = vector.shape_cast %105 : vector<1x256xi1> to vector<1x256xi1>
    %108 = vector.broadcast %107 : vector<1x256xi1> to vector<8x256xi1>
    %109 = vector.broadcast %cst_38 : f32 to vector<8x256xf32>
    %110 = arith.select %108, %103, %109 : vector<8x256xi1>, vector<8x256xf32>
    %111 = vector.broadcast %106 : vector<8x1xf32> to vector<8x256xf32>
    %112 = arith.mulf %111, %110 : vector<8x256xf32>
    %113 = arith.addf %102, %112 : vector<8x256xf32>
    %c253_i32 = arith.constant 253 : i32
    %114 = tpu.dynamic_rotate %98 by %c253_i32 dim 1 : vector<8x256xf32>, i32 -> vector<8x256xf32>
    %c1_i32_39 = arith.constant 1 : i32
    %115 = vector.broadcast %c1_i32_39 : i32 to vector<1x256xi32>
    %116 = arith.cmpi slt, %2, %115 : vector<1x256xi32>
    %117 = vector.extract_strided_slice %99 {offsets = [0, 3], sizes = [8, 1], strides = [1, 1]} : vector<8x5xf32> to vector<8x1xf32>
    %cst_40 = arith.constant 0.000000e+00 : f32
    %118 = vector.shape_cast %116 : vector<1x256xi1> to vector<1x256xi1>
    %119 = vector.broadcast %118 : vector<1x256xi1> to vector<8x256xi1>
    %120 = vector.broadcast %cst_40 : f32 to vector<8x256xf32>
    %121 = arith.select %119, %114, %120 : vector<8x256xi1>, vector<8x256xf32>
    %122 = vector.broadcast %117 : vector<8x1xf32> to vector<8x256xf32>
    %123 = arith.mulf %122, %121 : vector<8x256xf32>
    %124 = arith.addf %113, %123 : vector<8x256xf32>
    %c0_41 = arith.constant 0 : index
    %c0_42 = arith.constant 0 : index
    %125 = vector.load %arg9[%c0_41, %c0_42] : memref<8x1xf32, #tpu.memory_space<vmem>>, vector<8x1xf32>
    %126 = vector.broadcast %125 : vector<8x1xf32> to vector<8x256xf32>
    %127 = arith.addf %124, %126 : vector<8x256xf32>
    %128 = arith.truncf %127 : vector<8x256xf32> to vector<8x256xbf16>
    %c0_43 = arith.constant 0 : index
    %c0_44 = arith.constant 0 : index
    %129 = vector.load %arg10[%c0_43, %c0_44] : memref<8x8xbf16, #tpu.memory_space<vmem>>, vector<8x8xbf16>
    %cst_45 = arith.constant dense<0.000000e+00> : vector<8x256xf32>
    %130 = tpu.matmul %129, %128, %cst_45 {dimension_numbers = #tpu.dot_dimension_numbers<[1], [0], [0], [1], [0, 0, 1, 1], [], []>} : vector<8x8xbf16>, vector<8x256xbf16>, vector<8x256xf32> -> vector<8x256xf32>
    %c0_46 = arith.constant 0 : index
    %c0_47 = arith.constant 0 : index
    %131 = vector.load %arg11[%c0_46, %c0_47] : memref<8x1xf32, #tpu.memory_space<vmem>>, vector<8x1xf32>
    %132 = vector.broadcast %131 : vector<8x1xf32> to vector<8x256xf32>
    %133 = arith.addf %130, %132 : vector<8x256xf32>
    %134 = arith.mulf %47, %133 : vector<8x256xf32>
    %135 = arith.truncf %134 : vector<8x256xf32> to vector<8x256xbf16>
    %c0_48 = arith.constant 0 : index
    %c0_49 = arith.constant 0 : index
    %136 = vector.load %arg12[%c0_48, %c0_49] : memref<8x8xbf16, #tpu.memory_space<vmem>>, vector<8x8xbf16>
    %cst_50 = arith.constant dense<0.000000e+00> : vector<8x256xf32>
    %137 = tpu.matmul %136, %135, %cst_50 {dimension_numbers = #tpu.dot_dimension_numbers<[1], [0], [0], [1], [0, 0, 1, 1], [], []>} : vector<8x8xbf16>, vector<8x256xbf16>, vector<8x256xf32> -> vector<8x256xf32>
    %c0_51 = arith.constant 0 : index
    %c0_52 = arith.constant 0 : index
    %138 = vector.load %arg13[%c0_51, %c0_52] : memref<8x1xf32, #tpu.memory_space<vmem>>, vector<8x1xf32>
    %139 = vector.broadcast %138 : vector<8x1xf32> to vector<8x256xf32>
    %140 = arith.addf %137, %139 : vector<8x256xf32>
    %141 = arith.extf %1 : vector<8x256xbf16> to vector<8x256xf32>
    %142 = arith.addf %141, %140 : vector<8x256xf32>
    %c0_53 = arith.constant 0 : index
    %c0_54 = arith.constant 0 : index
    %c0_55 = arith.constant 0 : index
    %143 = vector.load %arg14[%c0_53, %c0_54, %c0_55] : memref<1x8x256xf32, #tpu.memory_space<vmem>>, vector<1x8x256xf32>
    %144 = vector.shape_cast %143 : vector<1x8x256xf32> to vector<8x256xf32>
    %145 = vector.shape_cast %142 : vector<8x256xf32> to vector<1x8x256xf32>
    tpu.vector_store %arg14[%c0_53, %c0_54, %c0_55], %145 {strides = array<i32>} : memref<1x8x256xf32, #tpu.memory_space<vmem>>, vector<1x8x256xf32>,
    return
  }
  func.func @transform_0(%arg0: i32, %arg1: i32) -> (i32, i32, i32) {
    %c0_i32 = arith.constant 0 : i32
    %c0_i32_0 = arith.constant 0 : i32
    return %arg0, %c0_i32, %arg1 : i32, i32, i32
  }
  func.func @transform_1(%arg0: i32, %arg1: i32) -> (i32, i32) {
    %c0_i32 = arith.constant 0 : i32
    %c0_i32_0 = arith.constant 0 : i32
    return %c0_i32, %arg1 : i32, i32
  }
  func.func @transform_2(%arg0: i32, %arg1: i32) -> (i32, i32) {
    %c0_i32 = arith.constant 0 : i32
    %c0_i32_0 = arith.constant 0 : i32
    %c0_i32_1 = arith.constant 0 : i32
    return %c0_i32, %c0_i32_0 : i32, i32
  }
  func.func @transform_3(%arg0: i32, %arg1: i32) -> (i32, i32) {
    %c0_i32 = arith.constant 0 : i32
    %c0_i32_0 = arith.constant 0 : i32
    %c0_i32_1 = arith.constant 0 : i32
    return %c0_i32, %c0_i32_0 : i32, i32
  }
  func.func @transform_4(%arg0: i32, %arg1: i32) -> (i32, i32) {
    %c0_i32 = arith.constant 0 : i32
    %c0_i32_0 = arith.constant 0 : i32
    %c0_i32_1 = arith.constant 0 : i32
    return %c0_i32, %c0_i32_0 : i32, i32
  }
  func.func @transform_5(%arg0: i32, %arg1: i32) -> (i32, i32) {
    %c0_i32 = arith.constant 0 : i32
    %c0_i32_0 = arith.constant 0 : i32
    %c0_i32_1 = arith.constant 0 : i32
    return %c0_i32, %c0_i32_0 : i32, i32
  }
  func.func @transform_6(%arg0: i32, %arg1: i32) -> (i32, i32) {
    %c0_i32 = arith.constant 0 : i32
    %c0_i32_0 = arith.constant 0 : i32
    %c0_i32_1 = arith.constant 0 : i32
    return %c0_i32, %c0_i32_0 : i32, i32
  }
  func.func @transform_7(%arg0: i32, %arg1: i32) -> (i32, i32) {
    %c0_i32 = arith.constant 0 : i32
    %c0_i32_0 = arith.constant 0 : i32
    %c0_i32_1 = arith.constant 0 : i32
    return %c0_i32, %c0_i32_0 : i32, i32
  }
  func.func @transform_8(%arg0: i32, %arg1: i32) -> (i32, i32) {
    %c0_i32 = arith.constant 0 : i32
    %c0_i32_0 = arith.constant 0 : i32
    %c0_i32_1 = arith.constant 0 : i32
    return %c0_i32, %c0_i32_0 : i32, i32
  }
  func.func @transform_9(%arg0: i32, %arg1: i32) -> (i32, i32) {
    %c0_i32 = arith.constant 0 : i32
    %c0_i32_0 = arith.constant 0 : i32
    %c0_i32_1 = arith.constant 0 : i32
    return %c0_i32, %c0_i32_0 : i32, i32
  }
  func.func @transform_10(%arg0: i32, %arg1: i32) -> (i32, i32) {
    %c0_i32 = arith.constant 0 : i32
    %c0_i32_0 = arith.constant 0 : i32
    %c0_i32_1 = arith.constant 0 : i32
    return %c0_i32, %c0_i32_0 : i32, i32
  }
  func.func @transform_11(%arg0: i32, %arg1: i32) -> (i32, i32) {
    %c0_i32 = arith.constant 0 : i32
    %c0_i32_0 = arith.constant 0 : i32
    %c0_i32_1 = arith.constant 0 : i32
    return %c0_i32, %c0_i32_0 : i32, i32
  }
  func.func @transform_12(%arg0: i32, %arg1: i32) -> (i32, i32, i32) {
    %c0_i32 = arith.constant 0 : i32
    %c0_i32_0 = arith.constant 0 : i32
    return %arg0, %c0_i32, %arg1 : i32, i32, i32
  }
}

</mosaic_0001>

<bundles_post_ra>
// kernel: tpu_custom_call.1
= control target key start
LH: loop header
LB: loop body
LE: loop exit
PB: predicated region body
PF: predicated region fallthrough
CT: control target
= control target key end

     0   :  { %s1557_s0 = inlined_call_operand.vmem [shape: bf16[2,8,256], index: 0, kind: input, shape index: {}]   ;;  %s1558_s1 = inlined_call_operand.hbm [shape: s32[1,256], index: 1, kind: input, shape index: {}]   ;;  %s1559_s2 = inlined_call_operand.vmem [shape: bf16[8,8], index: 2, kind: input, shape index: {}]   ;;  %s1560_s3 = inlined_call_operand.vmem [shape: f32[8,1], index: 3, kind: input, shape index: {}]   ;;  %s1561_s4 = inlined_call_operand.vmem [shape: f32[8,5], index: 4, kind: input, shape index: {}]   ;;  %s1562_s5 = inlined_call_operand.vmem [shape: f32[8,1], index: 5, kind: input, shape index: {}]   ;;  %s1563_s6 = inlined_call_operand.vmem [shape: f32[8,5], index: 6, kind: input, shape index: {}]   ;;  %s1564_s7 = inlined_call_operand.vmem [shape: f32[8,1], index: 7, kind: input, shape index: {}]   ;;  %s1565_s8 = inlined_call_operand.vmem [shape: bf16[8,8], index: 8, kind: input, shape index: {}]   ;;  %s1566_s9 = inlined_call_operand.vmem [shape: f32[8,1], index: 9, kind: input, shape index: {}]   ;;  %s1567_s10 = inlined_call_operand.vmem [shape: bf16[8,8], index: 10, kind: input, shape index: {}]   ;;  %s1568_s11 = inlined_call_operand.vmem [shape: f32[8,1], index: 11, kind: input, shape index: {}]   ;;  %s1569_s12 = inlined_call_operand.hbm [shape: f32[2,8,256], index: 12, kind: output, shape index: {}]  }
   0x1   :  { %1570 = sst [smem:[#allocation8_spill]] %s1557_s0 }
   0x2   :  { %1571 = sst [smem:[#allocation9_spill]] %s1558_s1 }
   0x3   :  { %1572 = sst [smem:[#allocation10_spill]] %s1559_s2 }
   0x4   :  { %17 = vsyncpa [#allocation3], 0 }
   0x5   :  { %18 = vsyncpa [#allocation4], 0 }
   0x6   :  { %20 = vsyncpa [#allocation4 + $0x1], 0  ;;  %s1286_s21 = smov 0   ;;  %s1288_s22 = smov 0  }
   0x7   :  { %s1290_s23 = smov 0   ;;  %s1292_s24 = smov 0  }
   0x8   :  { %s1294_s25 = smov 0   ;;  %s1296_s26 = smov 0  }
   0x9 LB: > { %s975_s27 = sadd.s32 4294967295, %s1207_s26   ;;  %s976_s28 = sadd.s32 4294967294, %s1207_s26   ;;  %s1207_s26 = sphi %s1296_s26, %s26_s26   ;;  %s1203_s25 = sphi %s1294_s25, %s1598_s25   ;;  %s1199_s24 = sphi %s1292_s24, %s1597_s24   ;;  %s1195_s23 = sphi %s1290_s23, %s1596_s23   ;;  %s1191_s22 = sphi %s1288_s22, %s1595_s22   ;;  %s1187_s21 = sphi %s1286_s21, %s1594_s21  }
   0xa   : > { %s38_s29 = sadd.s32 1, %s1203_s25  ;;  %s311_s30 = sadd.s32 1, %s1195_s23 }
   0xb   : > { %p40_p0 = scmp.ge.s32.totalorder %s38_s29, 2  ;;  %p321_p1 = scmp.ne.s32.totalorder %s1195_s23, %s1191_s22 }
   0xc   : > { %p322_p2 = scmp.eq.s32.totalorder %s975_s27, 1  ;;  %p327_p3 = scmp.ne.s32.totalorder %s1191_s22, %s1187_s21 }
   0xd   : > { %s1600_s29 = smov (%p40_p0, %s38_s29), 0  ;;  %p328_p5 = scmp.eq.s32.totalorder %s976_s28, 1 }
   0xe   : > { %p1326_p4 = por %p322_p2, %p321_p1  ;;  %s306_s14 = ssub.s32 %s1203_s25, %s1600_s29 }
   0xf   : > { %p977_p6 = scmp.ge.s32.totalorder %s1207_s26, 1  ;;  %p309_p7 = scmp.eq.s32.totalorder %s306_s14, 0 }
  0x10   : > { %p1333_p8 = por %p328_p5, %p327_p3  ;;  %p335_p9 = scmp.lt.s32.totalorder %s1207_s26, 3 }
  0x11   : > { %s1339_s16 = scalar_select %p309_p7, %s1195_s23, %s311_s30  }
  0x12   : > { %p336_p10 = pnand %p977_p6, %p335_p9  ;;  %p1012_p11 = scmp.eq.s32.totalorder %s975_s27, 0 }
  0x13   : > { %s1575_s1 = sld [smem:[#allocation9_spill]]  ;;  %s1209_s20 = smov [#allocation2]  }
  0x14   : > { %p1004_p12 = pneg %p336_p10  ;;  %s351_s28 = sshll.u32 %s1209_s20, 4  ;;  %s352_s28 = int_to_ptr.vmem [resolvable:$true] %s351_s28 }
  0x16   : > { %p1005_p13 = pnand %p1012_p11, %p1004_p12  ;;  %407 = sbr.rel (%p336_p10) target bundleno = 792 (0x318), region = 68 }
  0x19   : > { %s349_s19 = sshll.u32 %s1575_s1, 4  ;;  %s350_s19 = int_to_ptr.hbm [resolvable:$true] %s349_s19 }
  0x1a   : > { %1007 = dma.hbm_to_vmem [thread:$0]  (!%p1005_p13), %s350_s19, 32, %s352_s28, [#allocation3]  }
  0x1b   : > { %1178 = dma.done.wait (%p1012_p11), [#allocation3], 32  }
  0x1c   : > { %1180 = vsyncadd (%p1012_p11), [#allocation3], 4294967264  ;;  %p455_p0 = scmp.lt.s32.totalorder %s1199_s24, 1  ;;  %v1210_v0 = vmov 0   ;;  %v1211_v1 = vmov 2   ;;  %s1576_s0 = sld [smem:[#allocation8_spill]] }
  0x1d   : > { %1075 = vset.pattern.permute.xlu0 %v1210_v0  ;;  %1077 = vset.pattern.permute.xlu2 %v1210_v0  ;;  %v470_v3 = vld [vmem:[%s1560_s3] sm:$0xff]  ;;  %vm485_vm0 = vcmask 1043456   ;;  %s1577_s2 = sld [smem:[#allocation10_spill]]  ;;  %vm481_vm1 = vcmask 64512   ;;  %v1212_v27 = vmov 1   ;;  %v1213_v31 = vmov 3  }
  0x1e   : > { %s456_s27 = scalar_select %p455_p0, %s1199_s24, 1  ;;  %1076 = vset.pattern.permute.xlu1 %v1211_v1  ;;  %473 = vperm.xlu0 %1075, %v470_v3   ;;  %v1362_v6 = vld [vmem:[%s1561_s4] sm:$0xff] }
  0x1f   : > { %601 = vperm.xlu1 %1076, %v1362_v6   ;;  %624 = vperm.xlu2 %1077, %v1362_v6   ;;  %s1215_s1 = smov 1   ;;  %s1216_s14 = smov 2  }
  0x20   : > { %s996_s30 = sshll.u32 %s456_s27, 3  ;;  %s1217_s17 = smov 127  }
  0x21   : > { %s997_s19 = sshll.u32 %s1199_s24, 4 }
  0x22   : > { %s462_s18 = scalar_lea.vmem %s1576_s0, %s996_s30  ;;  %s1219_s30 = smov 125  }
  0x23   : > { %v1352_v2 = vld [vmem:[%s462_s18] sm:$0xff]  ;;  %s1218_s18 = smov 126   ;;  %s880_s27 = scalar_lea.hbm %s1569_s12, %s997_s19 }
  0x24   : > { %v477_v4 = vunpack.c.l.b16 %v1352_v2  ;;  %v478_v5 = vunpack.c.h.b16 %v1352_v2  ;;  %v469_v11 = vld [vmem:[%s1577_s2] sm:$0xf] }
  0x26   : > { %v479_v7 = vpack.c.b16 %v477_v4, %v477_v4  ;;  %v480_v8 = vpack.c.b16 %v478_v5, %v478_v5  ;;  %1082 = vset.pattern.permute.xlu0 %v1212_v27 }
  0x27   : > { %1078 = vset.pattern.permute.xlu1 %v1212_v27 }
  0x28   : > { %v487_v9 = vsel %vm485_vm0, %v479_v7, 0  ;;  %v490_v10 = vsel %vm485_vm0, %v480_v8, 0  ;;  %647 = vperm.xlu1 %1078, %v1362_v6  }
  0x29   : > { %499 = vmatpush.bf16.msra.mxu0 %v487_v9  ;;  %512 = vmatpush.bf16.msra.mxu1 %v490_v10 }
  0x2c   : > { %985 = vmatmul.msk.bf16.vlgmr.msra.gmra.mxu0 %vm481_vm1, %v469_v11  ;;  %986 = vmatmul.msk.bf16.vlgmr.msra.gmra.mxu1 %vm481_vm1, %v469_v11 }
  0x30   : > { %1079 = vset.pattern.permute.xlu1 %v1213_v31 }
  0x31   : > { %670 = vperm.xlu1 %1079, %v1362_v6  }
  0x90   : > { %v474_v12 = vpop.permute.xlu0 %473 }
  0xa9   : > { %v501_v13 = vpop.f32.mrf.mxu0  ;;  %v514_v14 = vpop.f32.mrf.mxu1 }
  0xaa   : > { %v1373_v15 = vadd.f32 %v501_v13, %v474_v12  ;;  %v1375_v16 = vadd.f32 %v514_v14, %v474_v12 }
  0xac   : > { %v1378_v17 = vmul.f32 0.70710677, %v1373_v15  ;;  %v1381_v18 = vmul.f32 0.70710677, %v1375_v16  ;;  %v518_v27 = vmul.f32 0.5, %v1373_v15  ;;  %v700_v15 = vld [vmem:[%s1562_s5] sm:$0xff] }
  0xae   : > { %v522_v19 = vand.u32 2147483647, %v1378_v17  ;;  %v523_v20 = vand.u32 2147483647, %v1381_v18  ;;  %vm588_vm10 = vcmp.lt.f32.partialorder %v1378_v17, 0.0  ;;  %vm589_vm11 = vcmp.lt.f32.partialorder %v1381_v18, 0.0  ;;  %v625_v18 = vpop.permute.xlu2 %624 }
  0xb0   : > { %v524_v21 = vmul.f32 0.3275911, %v522_v19  ;;  %v525_v22 = vmul.f32 0.3275911, %v523_v20  ;;  %v576_v47 = vsub.f32 0.0, %v522_v19  ;;  %v577_v51 = vsub.f32 0.0, %v523_v20 }
  0xb1   : > { %v503_v23 = vpop.f32.mrf.mxu0  ;;  %v516_v24 = vpop.f32.mrf.mxu1 }
  0xb2   : > { %v526_v25 = vadd.f32 1.0, %v524_v21  ;;  %v527_v26 = vadd.f32 1.0, %v525_v22  ;;  %v578_v54 = vmul.f32 %v576_v47, %v522_v19  ;;  %v579_v57 = vmul.f32 %v577_v51, %v523_v20 }
  0xb3   : > { %v1214_v24 = vmov 4  }
  0xb4   : > { %1087 = vrcp.f32 %v526_v25  ;;  %v539_v34 = vand.u32 2147483648, %v526_v25  ;;  %v537_v37 = vand.u32 2147483647, %v526_v25  ;;  %v554_v38 = vand.u32 2147483648, %v527_v26  ;;  %1080 = vset.pattern.permute.xlu1 %v1214_v24 }
  0xb5   : > { %1089 = vrcp.f32 %v527_v26  ;;  %v552_v40 = vand.u32 2147483647, %v527_v26  ;;  %vm533_vm4 = vweird.f32 %v526_v25  ;;  %vm548_vm6 = vweird.f32 %v527_v26 }
  0xb6   : > { %v540_v42 = vor.u32 1.1754944e-38, %v539_v34  ;;  %vm538_vm7 = vcmp.eq.f32.partialorder %v537_v37, 8.507059e+37  ;;  %v555_v45 = vor.u32 1.1754944e-38, %v554_v38  ;;  %v580_v60 = vmul.f32 1.442695, %v578_v54 }
  0xb7   : > { %vm553_vm9 = vcmp.eq.f32.partialorder %v552_v40, 8.507059e+37  ;;  %v582_v63 = vmul.f32 1.442695, %v579_v57  ;;  %v610_v38 = vlaneseq }
  0xb8   : > { %1091 = vpow2.f32 %v580_v60 }
  0xb9   : > { %1093 = vpow2.f32 %v582_v63 }
  0xba   : > { %v1088_v28 = vpop.eup %1087 }
  0xbb   : > { %v1090_v29 = vpop.eup %1089  ;;  %v529_v30 = vmul.f32 %v1088_v28, %v526_v25  ;;  %vm534_vm2 = vweird.f32 %v1088_v28 }
  0xbc   : > { %v544_v32 = vmul.f32 %v1090_v29, %v527_v26  ;;  %vm549_vm3 = vweird.f32 %v1090_v29  ;;  %vm535_vm5 = vmor %vm533_vm4, %vm534_vm2 }
  0xbd   : > { %v530_v33 = vsub.f32 1.0, %v529_v30  ;;  %vm550_vm8 = vmor %vm548_vm6, %vm549_vm3  ;;  %v519_v30 = vmul.f32 0.5, %v1375_v16  ;;  %v1412_v16 = vld [vmem:[%s1563_s6] sm:$0xff] }
  0xbe   : > { %v545_v35 = vsub.f32 1.0, %v544_v32  ;;  %v1092_v12 = vpop.eup %1091 }
  0xbf   : > { %v531_v36 = vmul.f32 %v1088_v28, %v530_v33  ;;  %v1094_v14 = vpop.eup %1093 }
  0xc0   : > { %v546_v39 = vmul.f32 %v1090_v29, %v545_v35  ;;  %v1417_v35 = vld [vmem:[#allocation2] sm:$0x3] }
  0xc1   : > { %v532_v41 = vadd.f32 %v1088_v28, %v531_v36  ;;  %vm615_vm12 = vcmp.ge.s32.totalorder %v1417_v35, 2  ;;  %vm638_vm13 = vcmp.ge.s32.totalorder %v1417_v35, 1  ;;  %vm661_vm14 = vcmp.lt.s32.totalorder %v1417_v35, 3 }
  0xc2   : > { %v547_v43 = vadd.f32 %v1090_v29, %v546_v39  ;;  %v616_v39 = vsel %vm615_vm12, 1, %v1210_v0  ;;  %v639_v40 = vsel %vm638_vm13, 1, %v1210_v0  ;;  %v662_v47 = vsel %vm661_vm14, 1, %v1210_v0 }
  0xc3   : > { %v536_v44 = vsel %vm535_vm5, %v1088_v28, %v532_v41  ;;  %v617_v41 = vperm.slane %v616_v39, 0  ;;  %vm684_vm5 = vcmp.lt.s32.totalorder %v1417_v35, 2  ;;  %v664_v54 = vperm.slane %v662_v47, 1 }
  0xc4   : > { %v541_v46 = vsel %vm538_vm7, %v540_v42, %v536_v44  ;;  %v551_v48 = vsel %vm550_vm8, %v1090_v29, %v547_v43  ;;  %v618_v42 = vperm.slane %v616_v39, 1  ;;  %vm723_vm14 = vcmp.ge.s32.totalorder %v1417_v35, 3 }
  0xc5   : > { %v558_v49 = vmul.f32 1.0614054, %v541_v46  ;;  %v556_v50 = vsel %vm553_vm9, %v555_v45, %v551_v48  ;;  %v641_v48 = vperm.slane %v639_v40, 1  ;;  %vm1428_vm2 = vcmp.eq.s32.totalorder %v617_v41, 1 }
  0xc6   : > { %v559_v52 = vmul.f32 1.0614054, %v556_v50  ;;  %vm1432_vm3 = vcmp.eq.s32.totalorder %v618_v42, 1 }
  0xc7   : > { %v560_v53 = vadd.f32 -1.4531521, %v558_v49  ;;  %vm1443_vm8 = vcmp.eq.s32.totalorder %v641_v48, 1 }
  0xc8   : > { %v561_v55 = vadd.f32 -1.4531521, %v559_v52 }
  0xc9   : > { %v562_v56 = vmul.f32 %v560_v53, %v541_v46  ;;  %v663_v53 = vperm.slane %v662_v47, 0  ;;  %v773_v47 = vld [vmem:[%s1566_s9] sm:$0xff] }
  0xca   : > { %v563_v58 = vmul.f32 %v561_v55, %v556_v50 }
  0xcb   : > { %v564_v59 = vadd.f32 1.4214138, %v562_v56  ;;  %vm1452_vm9 = vcmp.eq.s32.totalorder %v663_v53, 1 }
  0xcc   : > { %v565_v61 = vadd.f32 1.4214138, %v563_v58 }
  0xcd   : > { %v566_v62 = vmul.f32 %v564_v59, %v541_v46  ;;  %v685_v59 = vsel %vm684_vm5, 1, %v1210_v0 }
  0xce   : > { %v567_v3 = vmul.f32 %v565_v61, %v556_v50 }
  0xcf   : > { %v568_v4 = vadd.f32 -0.28449672, %v566_v62 }
  0xd0   : > { %v569_v5 = vadd.f32 -0.28449672, %v567_v3 }
  0xd1   : > { %v570_v7 = vmul.f32 %v568_v4, %v541_v46 }
  0xd2   : > { %v571_v8 = vmul.f32 %v569_v5, %v556_v50 }
  0xd3   : > { %v572_v9 = vadd.f32 0.2548296, %v570_v7 }
  0xd4   : > { %v573_v10 = vadd.f32 0.2548296, %v571_v8 }
  0xd5   : > { %v574_v11 = vmul.f32 %v572_v9, %v541_v46  ;;  %v640_v46 = vperm.slane %v639_v40, 0  ;;  %v686_v9 = vperm.slane %v685_v59, 0 }
  0xd6   : > { %v575_v13 = vmul.f32 %v573_v10, %v556_v50  ;;  %v687_v10 = vperm.slane %v685_v59, 1 }
  0xd7   : > { %v584_v19 = vmul.f32 %v1092_v12, %v574_v11  ;;  %vm1438_vm6 = vcmp.eq.s32.totalorder %v640_v46, 1  ;;  %vm1471_vm12 = vcmp.eq.s32.totalorder %v686_v9, 1  ;;  %v762_v46 = vld [vmem:[%s1564_s7] sm:$0xff] }
  0xd8   : > { %v585_v20 = vmul.f32 %v1094_v14, %v575_v13  ;;  %vm1475_vm13 = vcmp.eq.s32.totalorder %v687_v10, 1 }
  0xd9   : > { %v586_v21 = vsub.f32 1.0, %v584_v19 }
  0xda   : > { %v587_v22 = vsub.f32 1.0, %v585_v20 }
  0xdb   : > { %v590_v23 = vsub.f32 0.0, %v586_v21 }
  0xdc   : > { %v591_v25 = vsub.f32 0.0, %v587_v22 }
  0xdd   : > { %v592_v26 = vsel %vm588_vm10, %v590_v23, %v586_v21  ;;  %vm1456_vm10 = vcmp.eq.s32.totalorder %v664_v54, 1 }
  0xde   : > { %v594_v28 = vadd.f32 1.0, %v592_v26  ;;  %v593_v29 = vsel %vm589_vm11, %v591_v25, %v587_v22 }
  0xdf   : > { %v595_v32 = vadd.f32 1.0, %v593_v29 }
  0xe0   : > { %v1392_v33 = vmul.f32 %v594_v28, %v518_v27 }
  0xe1   : > { %v1394_v34 = vmul.f32 %v595_v32, %v519_v30 }
  0xe2   : > { %631 = vrot.lane.b32.xlu2 %v1392_v33, %s1215_s1  ;;  %606 = vrot.lane.b32.xlu0 %v1392_v33, %s1216_s14 }
  0xe3   : > { %608 = vrot.lane.b32.xlu1 %v1394_v34, %s1216_s14  ;;  %s884_s14 = sshll.u32 %s880_s27, 4  ;;  %s885_s14 = int_to_ptr.hbm [resolvable:$true] %s884_s14 }
  0xe4   : > { %s1139_s19 = sshra.s32 %s885_s14, 4  ;;  %s1140_s19 = int_to_ptr.hbm [resolvable:$true] %s1139_s19 }
  0xe5   : > { %s1141_s20 = scalar_lea.hbm %s1140_s19, 16  ;;  %p1146_p5 = scmp.lt.s32.totalorder %s1140_s19, %s1569_s12 }
  0xe6   : > { %p1142_p1 = scmp.ne.s32.totalorder %s1140_s19, %s1141_s20 }
  0xe8   : > { %p1143_p2 = pnand %p1142_p1, %p1326_p4 }
  0xea   : > { %654 = vrot.lane.b32.xlu2 %v1392_v33, %s1217_s17  ;;  %633 = vrot.lane.b32.xlu0 %v1394_v34, %s1215_s1  ;;  %s1220_s1 = smov 3   ;;  %p1144_p3 = pneg %p1143_p2 }
  0xeb   : > { %693 = vperm.xlu1 %1080, %v1362_v6   ;;  %v602_v6 = vpop.permute.xlu1 %601 }
  0xec   : > { %v604_v20 = vmul.f32 %v602_v6, %v1392_v33  ;;  %v605_v21 = vmul.f32 %v602_v6, %v1394_v34 }
  0xf2   : > { %677 = vrot.lane.b32.xlu2 %v1392_v33, %s1218_s18  ;;  %656 = vrot.lane.b32.xlu0 %v1394_v34, %s1217_s17  ;;  %s451_s17 = sand.u32 1, %s1191_s22  }
  0xf3   : > { %1083 = vset.pattern.permute.xlu1 %v1213_v31  ;;  %v648_v17 = vpop.permute.xlu1 %647  ;;  %s867_s24 = scalar_lea.sflag [#allocation4], %s451_s17 }
  0xfa   : > { %703 = vperm.xlu2 %1077, %v700_v15   ;;  %679 = vrot.lane.b32.xlu0 %v1394_v34, %s1218_s18  ;;  %s982_s18 = sshll.u32 %s451_s17, 4 }
  0xfb   : > { %v671_v31 = vpop.permute.xlu1 %670 }
 0x102   : > { %1081 = vset.pattern.permute.xlu2 %v1211_v1  ;;  %v1422_v1 = vand.u32 127, %v610_v38 }
 0x103   : > { %711 = vperm.xlu2 %1081, %v1412_v16  }
 0x104   : > { %vm612_vm15 = vcmp.lt.s32.totalorder %v1422_v1, 2  ;;  %vm635_vm4 = vcmp.lt.s32.totalorder %v1422_v1, 1  ;;  %vm658_vm7 = vcmp.lt.s32.totalorder %v1422_v1, 127  ;;  %vm681_vm11 = vcmp.lt.s32.totalorder %v1422_v1, 126 }
 0x105   : > { %vm743_vm5 = vcmp.lt.s32.totalorder %v1422_v1, 125 }
 0x10b   : > { %1084 = vset.pattern.permute.xlu2 %v1210_v0 }
 0x13c   : > { %v632_v36 = vpop.permute.xlu2 %631 }
 0x144   : > { %v655_v44 = vpop.permute.xlu2 %654 }
 0x14c   : > { %v678_v13 = vpop.permute.xlu2 %677 }
 0x154   : > { %v607_v37 = vpop.permute.xlu0 %606 }
 0x155   : > { %v609_v45 = vpop.permute.xlu1 %608 }
 0x156   : > { %v613_v51 = vsel %vm612_vm15, %v607_v37, %v609_v45  ;;  %v614_v52 = vsel %vm612_vm15, %v609_v45, %v607_v37  ;;  %vm746_vm15 = vcmp.lt.s32.totalorder %v1417_v35, 1 }
 0x157   : > { %v621_v60 = vsel %vm1428_vm2, %v614_v52, 0.0  ;;  %v622_v61 = vsel %vm1432_vm3, %v613_v51, 0.0  ;;  %v724_v51 = vsel %vm723_vm14, 1, %v1210_v0  ;;  %v747_v53 = vsel %vm746_vm15, 1, %v1210_v0 }
 0x158   : > { %v627_v11 = vmul.f32 %v625_v18, %v621_v60  ;;  %v628_v12 = vmul.f32 %v625_v18, %v622_v61  ;;  %v725_v52 = vperm.slane %v724_v51, 0  ;;  %vm720_vm2 = vcmp.lt.s32.totalorder %v1422_v1, 3 }
 0x159   : > { %v748_v55 = vperm.slane %v747_v53, 0  ;;  %v749_v56 = vperm.slane %v747_v53, 1 }
 0x15a   : > { %v629_v26 = vadd.f32 %v627_v11, %v604_v20  ;;  %v630_v27 = vadd.f32 %v628_v12, %v605_v21  ;;  %vm727_vm3 = vcmp.eq.s32.totalorder %v725_v52, 1 }
 0x15c   : > { %v634_v43 = vpop.permute.xlu0 %633 }
 0x15d   : > { %v636_v57 = vsel %vm635_vm4, %v632_v36, %v634_v43  ;;  %v637_v58 = vsel %vm635_vm4, %v634_v43, %v632_v36  ;;  %v694_v32 = vpop.permute.xlu1 %693 }
 0x15e   : > { %v644_v7 = vsel %vm1438_vm6, %v637_v58, 0.0  ;;  %v645_v8 = vsel %vm1443_vm8, %v636_v57, 0.0  ;;  %vm750_vm6 = vcmp.eq.s32.totalorder %v748_v55, 1 }
 0x15f   : > { %v650_v22 = vmul.f32 %v648_v17, %v644_v7  ;;  %v651_v23 = vmul.f32 %v648_v17, %v645_v8 }
 0x161   : > { %v652_v15 = vadd.f32 %v650_v22, %v629_v26  ;;  %v653_v6 = vadd.f32 %v651_v23, %v630_v27  ;;  %v772_v26 = vld [vmem:[%s1565_s8] sm:$0xf] }
 0x162   : > { %v819_v27 = vld [vmem:[%s1568_s11] sm:$0xff] }
 0x164   : > { %v657_v62 = vpop.permute.xlu0 %656 }
 0x165   : > { %v659_v4 = vsel %vm658_vm7, %v655_v44, %v657_v62  ;;  %v660_v5 = vsel %vm658_vm7, %v657_v62, %v655_v44  ;;  %v704_v44 = vpop.permute.xlu2 %703  ;;  %vm751_vm7 = vcmp.eq.s32.totalorder %v749_v56, 1 }
 0x166   : > { %v667_v14 = vsel %vm1452_vm9, %v659_v4, 0.0  ;;  %v668_v19 = vsel %vm1456_vm10, %v660_v5, 0.0 }
 0x167   : > { %v673_v28 = vmul.f32 %v671_v31, %v667_v14  ;;  %v674_v29 = vmul.f32 %v671_v31, %v668_v19 }
 0x169   : > { %v675_v38 = vadd.f32 %v673_v28, %v652_v15  ;;  %v676_v39 = vadd.f32 %v674_v29, %v653_v6 }
 0x16c   : > { %v680_v30 = vpop.permute.xlu0 %679 }
 0x16d   : > { %v682_v18 = vsel %vm681_vm11, %v678_v13, %v680_v30  ;;  %v683_v17 = vsel %vm681_vm11, %v680_v30, %v678_v13  ;;  %v712_v50 = vpop.permute.xlu2 %711 }
 0x16e   : > { %v690_v36 = vsel %vm1471_vm12, %v682_v18, 0.0  ;;  %v691_v37 = vsel %vm1475_vm13, %v683_v17, 0.0 }
 0x16f   : > { %v696_v40 = vmul.f32 %v694_v32, %v690_v36  ;;  %v697_v41 = vmul.f32 %v694_v32, %v691_v37 }
 0x171   : > { %v698_v42 = vadd.f32 %v696_v40, %v675_v38  ;;  %v699_v43 = vadd.f32 %v697_v41, %v676_v39  ;;  %v818_v41 = vld [vmem:[%s1567_s10] sm:$0xf] }
 0x173   : > { %v706_v31 = vadd.f32 %v704_v44, %v698_v42  ;;  %v707_v45 = vadd.f32 %v704_v44, %v699_v43  ;;  %v861_v42 = vunpack.c.h.bf16 %v1352_v2 }
 0x175   : > { %741 = vrot.lane.b32.xlu2 %v707_v45, %s1219_s30  ;;  %718 = vrot.lane.b32.xlu1 %v707_v45, %s1220_s1  ;;  %v714_v4 = vmul.f32 %v712_v50, %v706_v31  ;;  %v715_v5 = vmul.f32 %v712_v50, %v707_v45 }
 0x176   : > { %716 = vrot.lane.b32.xlu0 %v706_v31, %s1220_s1 }
 0x17d   : > { %739 = vrot.lane.b32.xlu1 %v706_v31, %s1219_s30  ;;  %765 = vperm.xlu2 %1084, %v762_v46   ;;  %s453_s30 = scalar_lea.vmem [#allocation5], %s982_s18  ;;  %s1145_s18 = scalar_lea.hbm %s1569_s12, 32 }
 0x17e   : > { %732 = vperm.xlu0 %1082, %v1412_v16   ;;  %s882_s1 = sshll.u32 %s453_s30, 4  ;;  %p1147_p6 = scmp.lt.s32.totalorder %s1145_s18, %s1141_s20  ;;  %s883_s1 = int_to_ptr.vmem [resolvable:$true] %s882_s1 }
 0x180   : > { %p1148_p7 = por %p1147_p6, %p1146_p5 }
 0x182   : > { %p1149_p9 = pnand %p1148_p7, %p1144_p3 }
 0x185   : > { %755 = vperm.xlu1 %1083, %v1412_v16   ;;  %v726_v16 = vperm.slane %v724_v51, 1 }
 0x186   : > { %1085 = vset.pattern.permute.xlu0 %v1210_v0 }
 0x187   : > { %776 = vperm.xlu0 %1085, %v773_v47   ;;  %vm728_vm4 = vcmp.eq.s32.totalorder %v726_v16, 1 }
 0x18d   : > { %1086 = vset.pattern.permute.xlu1 %v1210_v0 }
 0x18e   : > { %822 = vperm.xlu1 %1086, %v819_v27  }
 0x1cf   : > { %v742_v59 = vpop.permute.xlu2 %741 }
 0x1d7   : > { %v766_v14 = vpop.permute.xlu2 %765 }
 0x1e7   : > { %v719_v48 = vpop.permute.xlu1 %718 }
 0x1e8   : > { %v717_v49 = vpop.permute.xlu0 %716 }
 0x1e9   : > { %v721_v57 = vsel %vm720_vm2, %v717_v49, %v719_v48  ;;  %v722_v58 = vsel %vm720_vm2, %v719_v48, %v717_v49 }
 0x1ea   : > { %v729_v61 = vsel %vm727_vm3, %v722_v58, 0.0  ;;  %v730_v62 = vsel %vm728_vm4, %v721_v57, 0.0 }
 0x1ef   : > { %v740_v54 = vpop.permute.xlu1 %739 }
 0x1f0   : > { %v733_v60 = vpop.permute.xlu0 %732  ;;  %v744_v35 = vsel %vm743_vm5, %v740_v54, %v742_v59  ;;  %v745_v63 = vsel %vm743_vm5, %v742_v59, %v740_v54 }
 0x1f1   : > { %v735_v0 = vmul.f32 %v733_v60, %v729_v61  ;;  %v736_v3 = vmul.f32 %v733_v60, %v730_v62  ;;  %v752_v7 = vsel %vm750_vm6, %v744_v35, 0.0  ;;  %v753_v8 = vsel %vm751_vm7, %v745_v63, 0.0 }
 0x1f3   : > { %v737_v10 = vadd.f32 %v735_v0, %v714_v4  ;;  %v738_v11 = vadd.f32 %v736_v3, %v715_v5 }
 0x1f7   : > { %v756_v9 = vpop.permute.xlu1 %755 }
 0x1f8   : > { %v758_v12 = vmul.f32 %v756_v9, %v752_v7  ;;  %v759_v13 = vmul.f32 %v756_v9, %v753_v8 }
 0x1f9   : > { %v777_v28 = vpop.permute.xlu0 %776 }
 0x1fa   : > { %v760_v1 = vadd.f32 %v758_v12, %v737_v10  ;;  %v761_v19 = vadd.f32 %v759_v13, %v738_v11 }
 0x1fc   : > { %v768_v20 = vadd.f32 %v766_v14, %v760_v1  ;;  %v769_v21 = vadd.f32 %v766_v14, %v761_v19 }
 0x1fe   : > { %v770_v22 = vpack.c.bf16 %v768_v20, %v768_v20  ;;  %v771_v23 = vpack.c.bf16 %v769_v21, %v769_v21 }
 0x200   : > { %v783_v24 = vsel %vm485_vm0, %v770_v22, 0  ;;  %v786_v25 = vsel %vm485_vm0, %v771_v23, 0 }
 0x201   : > { %795 = vmatpush.bf16.msra.mxu2 %v783_v24  ;;  %808 = vmatpush.bf16.msra.mxu3 %v786_v25 }
 0x204   : > { %987 = vmatmul.msk.bf16.vlgmr.msra.gmra.mxu2 %vm481_vm1, %v772_v26  ;;  %988 = vmatmul.msk.bf16.vlgmr.msra.gmra.mxu3 %vm481_vm1, %v772_v26 }
 0x287   : > { %v810_v29 = vpop.f32.mrf.mxu3  ;;  %v797_v30 = vpop.f32.mrf.mxu2 }
 0x288   : > { %v811_v32 = vadd.f32 %v810_v29, %v777_v28  ;;  %v798_v15 = vadd.f32 %v797_v30, %v777_v28 }
 0x28a   : > { %v815_v6 = vmul.f32 %v811_v32, %v1394_v34  ;;  %v814_v18 = vmul.f32 %v798_v15, %v1392_v33  ;;  %v823_v33 = vpop.permute.xlu1 %822  ;;  %v860_v34 = vunpack.c.l.bf16 %v1352_v2 }
 0x28c   : > { %v816_v17 = vpack.c.bf16 %v814_v18, %v814_v18  ;;  %v817_v36 = vpack.c.bf16 %v815_v6, %v815_v6 }
 0x28e   : > { %v829_v37 = vsel %vm485_vm0, %v816_v17, 0  ;;  %v832_v38 = vsel %vm485_vm0, %v817_v36, 0 }
 0x28f   : > { %v799_v39 = vpop.f32.mrf.mxu2  ;;  %v812_v40 = vpop.f32.mrf.mxu3  ;;  %841 = vmatpush.bf16.msrb.mxu0 %v829_v37  ;;  %854 = vmatpush.bf16.msrb.mxu1 %v832_v38 }
 0x292   : > { %989 = vmatmul.msk.bf16.vlgmr.msrb.gmra.mxu0 %vm481_vm1, %v818_v41  ;;  %990 = vmatmul.msk.bf16.vlgmr.msrb.gmra.mxu1 %vm481_vm1, %v818_v41 }
 0x30f   : > { %v843_v43 = vpop.f32.mrf.mxu0  ;;  %v856_v44 = vpop.f32.mrf.mxu1 }
 0x310   : > { %v844_v31 = vadd.f32 %v843_v43, %v823_v33  ;;  %v857_v45 = vadd.f32 %v856_v44, %v823_v33 }
 0x312   : > { %v862_v46 = vadd.f32 %v860_v34, %v844_v31  ;;  %v863_v47 = vadd.f32 %v861_v42, %v857_v45 }
 0x314   : > { %864 = vst [vmem:[%s453_s30] sm:$0xff] %v862_v46 }
 0x315   : > { %865 = vst [vmem:[%s453_s30 + $0x8] sm:$0xff] %v863_v47 }
 0x316   : > { %1152 = shalt.err (!%p1149_p9)
}
 0x317   : > { %1002 = dma.vmem_to_hbm [thread:$0]  (%p1326_p4), %s883_s1, 256, %s885_s14, %s867_s24   ;;  %v845_v2 = vpop.f32.mrf.mxu0  ;;  %v858_v48 = vpop.f32.mrf.mxu1 }
 0x318 PF: > { %p1014_p10 = scmp.ge.s32.totalorder %s1207_s26, 2  ;;  %s896_s0 = sand.u32 1, %s1187_s21  }
 0x319   : > { %s897_s2 = scalar_lea.sflag [#allocation4], %s896_s0 }
 0x31a   : > { %p1009_p11 = pnand %p1014_p10, %p1333_p8 }
 0x31c   : > { %p1010_p12 = pneg %p1009_p11 }
 0x31e   : > { %1182 = dma.done.wait (%p1010_p12), %s897_s2, 256  }
 0x31f   : > { %1184 = vsyncadd (%p1010_p12), %s897_s2, 4294967040  ;;  %s26_s26 = sadd.s32 1, %s1207_s26   ;;  %s1594_s21 = smov %s1191_s22 }
 0x320   : > { %p23_p13 = scmp.ge.s32.totalorder %s26_s26, 4   ;;  %s1595_s22 = smov %s1195_s23 }
 0x321   : > { %s1596_s23 = smov %s1339_s16  ;;  %s1597_s24 = smov %s1203_s25 }
 0x322   : > { %s1598_s25 = smov %s1600_s29  ;;  %25 = sbr.rel (!%p23_p13) target bundleno = 9 (0x9), region = 109 }
 0x327   :  { %903 = vsyncpa [#allocation3], 1 }
 0x328   :  { %905 = vsyncpa [#allocation3 + $0x1], 1 }
 0x329   :  { %906 = vsyncpa [#allocation4], 1 }
 0x32a   :  { %908 = vsyncpa [#allocation4 + $0x1], 1 }

</bundles_post_ra>
